<compile_context>
chip_gen: v7x
topology: tpu7x:2x2x1
jax: 0.10.0
libtpu: 0.0.40
codegen_flags: <defaults>
</compile_context>

<pallas_src>
import functools

import jax
import jax.numpy as jnp
from jax import lax
from jax.experimental import pallas as pl
from jax.experimental.pallas import tpu as pltpu


_SLAB = 1024  # lanes per inner strip-mined slab (8 vregs per f32 intermediate)


def _fused_kernel(x_ref, w_ref, b_ref, o_ref, *, slab):
    # x_ref: (1, C_in, HWT)   pixels, spatial on the lane axis
    # w_ref: (C_in, C_out, 1) resident weight columns
    # b_ref: (C_out, 1)       resident bias column
    # o_ref: (1, C_out, HWT)  lane-dense output block
    c_in = x_ref.shape[1]
    n_slabs = x_ref.shape[2] // slab  # static; wrapper guarantees divisibility

    def body(s, carry):
        i = pl.multiple_of(s * slab, 128)
        xs = x_ref[0, :, pl.ds(i, slab)]              # (C_in, slab)

        # 1x1 transposed conv == per-pixel channel mix; far too small for the
        # MXU, so do it as a short VPU broadcast-FMA chain:
        #   v1[oc, p] = sum_ic w[ic, oc] * x[ic, p] + b[oc]
        v1 = w_ref[0] * xs[0:1, :]                    # (C_out,1)*(1,slab)
        for ic in range(1, c_in):
            v1 = v1 + w_ref[ic] * xs[ic:ic + 1, :]
        v1 = v1 + b_ref[...]

        # Elementwise tail exactly as the module specifies (not jax.nn.gelu),
        # re-expressed so only v1 and v5 are live at full width:
        #   v5 = erf(v1/sqrt(2)) + 1 ; out = (0.5*v1 + v5) * v5
        v5 = lax.erf(v1 * 0.7071067811865476) + 1.0
        o_ref[0, :, pl.ds(i, slab)] = ((v1 * 0.5 + v5) * v5).astype(o_ref.dtype)
        return carry

    lax.fori_loop(0, n_slabs, body, 0, unroll=min(8, n_slabs))


def _select_tile(HW, N):
    """Pick the spatial (lane) tile size, generation-aware."""
    hw_lanes = pl.cdiv(HW, 128) * 128

    try:
        info = pltpu.get_tpu_info()
        vmem_bytes = int(getattr(info, "vmem_capacity_bytes", 64 << 20))
    except Exception:  # be conservative (v7x has the smallest VMEM: 64 MiB)
        vmem_bytes = 64 << 20

    # Double-buffered in+out tile cost ~ 128 B per lane (C_in pads to 8
    # sublanes in VMEM: 32*hwt B in + 32*hwt B out, x2 buffers).
    cap_by_vmem = int(0.4 * vmem_bytes) // 128
    cap = min(cap_by_vmem, 256 * 1024)
    hwt = min(hw_lanes, max(128, (cap // 128) * 128))

    # Megacore (v7x): if a single image would be one grid step, split HW into
    # >= 2 tiles so the "parallel" grid axis can shard across both TCs.
    if N == 1 and hwt >= hw_lanes and hw_lanes >= 2 * 128:
        hwt = pl.cdiv(hw_lanes // 2, 128) * 128

    # Make the tile a multiple of the inner slab (or shrink the slab).
    if hwt >= _SLAB:
        hwt = (hwt // _SLAB) * _SLAB
        slab = _SLAB
    else:
        slab = hwt
    return hwt, slab, vmem_bytes


def model_forward(x_nchw, weight, bias):
    """x_nchw: (N, C_in, H, W); weight: (C_in, C_out); bias: (C_out,)."""
    N, C_in, H, W = x_nchw.shape
    C_out = weight.shape[1]
    HW = H * W

    # NCHW-native: merge spatial dims only (free reshape, no transpose).
    x3 = x_nchw.reshape(N, C_in, HW)
    w3 = weight.reshape(C_in, C_out, 1).astype(jnp.float32)
    b2 = bias.reshape(C_out, 1).astype(jnp.float32)

    hwt, slab, vmem_bytes = _select_tile(HW, N)
    grid_j = pl.cdiv(HW, hwt)  # ragged last tile handled by boundary blocks

    vmem_limit = min(int(0.9 * vmem_bytes),
                     max(32 << 20, 128 * hwt + (4 << 20)))

    out3 = pl.pallas_call(
        functools.partial(_fused_kernel, slab=slab),
        out_shape=jax.ShapeDtypeStruct((N, C_out, HW), jnp.float32),
        grid_spec=pltpu.PrefetchScalarGridSpec(
            num_scalar_prefetch=0,
            grid=(N, grid_j),
            in_specs=[
                pl.BlockSpec((1, C_in, hwt), lambda n, j: (n, 0, j)),
                pl.BlockSpec((C_in, C_out, 1), lambda n, j: (0, 0, 0)),
                pl.BlockSpec((C_out, 1), lambda n, j: (0, 0)),
            ],
            out_specs=pl.BlockSpec((1, C_out, hwt), lambda n, j: (n, 0, j)),
        ),
        compiler_params=pltpu.CompilerParams(
            dimension_semantics=("parallel", "parallel"),
            vmem_limit_bytes=vmem_limit,
        ),
    )(x3, w3, b2)

    return out3.reshape(N, C_out, H, W)


def reference_forward(x_nchw, weight, bias):
    # Pure-JAX reference of the PyTorch forward.
    v1 = jnp.einsum("nihw,io->nohw", x_nchw, weight) + bias[None, :, None, None]
    v2 = v1 * 0.5
    v3 = v1 * 0.7071067811865476
    v4 = lax.erf(v3)
    v5 = v4 + 1.0
    v6 = v2 + v5
    return v6 * v5


if __name__ == "__main__":
    key = jax.random.PRNGKey(0)
    k_x, k_w, k_b = jax.random.split(key, 3)

    # Shapes from the module spec: x1 = (1, 3, 64, 64), ConvTranspose2d(3, 8, 1).
    N, C_in, H, W, C_out = 1, 3, 64, 64, 8

    x = jax.random.normal(k_x, (N, C_in, H, W), dtype=jnp.float32)
    # ConvTranspose2d weight is (in_ch, out_ch, 1, 1); spatial dims squeezed.
    weight = 0.1 * jax.random.normal(k_w, (C_in, C_out), dtype=jnp.float32)
    bias = 0.1 * jax.random.normal(k_b, (C_out,), dtype=jnp.float32)

    fwd = jax.jit(model_forward)
    out = jax.block_until_ready(fwd(x, weight, bias))

    ref = reference_forward(x, weight, bias)
    assert out.shape == (N, C_out, H, W)
    assert jnp.allclose(out, ref, atol=1e-5, rtol=1e-5), "mismatch vs reference"

    print("KERNEL_OK")
</pallas_src>

<mosaic_0001>
module attributes {stable_mosaic.version = 11 : i64} {
  func.func @_fused_kernel(%arg0: i32, %arg1: i32, %arg2: memref<1x3x2048xf32, #tpu.memory_space<vmem>>, %arg3: memref<3x8x1xf32, #tpu.memory_space<vmem>>, %arg4: memref<8x1xf32, #tpu.memory_space<vmem>>, %arg5: memref<1x8x2048xf32, #tpu.memory_space<vmem>>) attributes {dimension_semantics = [#tpu.dimension_semantics<parallel>, #tpu.dimension_semantics<parallel>], iteration_bounds = array<i64: 1, 2>, scalar_prefetch = 0 : i64, scratch_operands = 0 : i64, tpu.core_type = #tpu.core_type<tc>, window_params = [{transform_indices = @transform_0, window_bounds = array<i64: 1, 3, 2048>}, {pipeline_mode = #tpu.pipeline_mode<synchronous>, transform_indices = @transform_1, window_bounds = array<i64: 3, 8, 1>}, {pipeline_mode = #tpu.pipeline_mode<synchronous>, transform_indices = @transform_2, window_bounds = array<i64: 8, 1>}, {transform_indices = @transform_3, window_bounds = array<i64: 1, 8, 2048>}]} {
    %c0_i32 = arith.constant 0 : i32
    %c1024_i32 = arith.constant 1024 : i32
    %0 = arith.muli %c0_i32, %c1024_i32 : i32
    %1 = tpu.assume_multiple %0, 128 : i32
    %c0 = arith.constant 0 : index
    %c0_0 = arith.constant 0 : index
    %2 = arith.index_cast %1 : i32 to index
    %3 = vector.load %arg2[%c0, %c0_0, %2] : memref<1x3x2048xf32, #tpu.memory_space<vmem>>, vector<1x3x1024xf32>
    %4 = vector.shape_cast %3 : vector<1x3x1024xf32> to vector<3x1024xf32>
    %c0_1 = arith.constant 0 : index
    %c0_2 = arith.constant 0 : index
    %c0_3 = arith.constant 0 : index
    %5 = vector.load %arg3[%c0_1, %c0_2, %c0_3] : memref<3x8x1xf32, #tpu.memory_space<vmem>>, vector<1x8x1xf32>
    %6 = vector.shape_cast %5 : vector<1x8x1xf32> to vector<8x1xf32>
    %7 = vector.extract_strided_slice %4 {offsets = [0, 0], sizes = [1, 1024], strides = [1, 1]} : vector<3x1024xf32> to vector<1x1024xf32>
    %8 = vector.broadcast %6 : vector<8x1xf32> to vector<8x1024xf32>
    %9 = vector.broadcast %7 : vector<1x1024xf32> to vector<8x1024xf32>
    %10 = arith.mulf %8, %9 : vector<8x1024xf32>
    %c1 = arith.constant 1 : index
    %c0_4 = arith.constant 0 : index
    %c0_5 = arith.constant 0 : index
    %11 = vector.load %arg3[%c1, %c0_4, %c0_5] : memref<3x8x1xf32, #tpu.memory_space<vmem>>, vector<1x8x1xf32>
    %12 = vector.shape_cast %11 : vector<1x8x1xf32> to vector<8x1xf32>
    %13 = vector.extract_strided_slice %4 {offsets = [1, 0], sizes = [1, 1024], strides = [1, 1]} : vector<3x1024xf32> to vector<1x1024xf32>
    %14 = vector.broadcast %12 : vector<8x1xf32> to vector<8x1024xf32>
    %15 = vector.broadcast %13 : vector<1x1024xf32> to vector<8x1024xf32>
    %16 = arith.mulf %14, %15 : vector<8x1024xf32>
    %17 = arith.addf %10, %16 : vector<8x1024xf32>
    %c2 = arith.constant 2 : index
    %c0_6 = arith.constant 0 : index
    %c0_7 = arith.constant 0 : index
    %18 = vector.load %arg3[%c2, %c0_6, %c0_7] : memref<3x8x1xf32, #tpu.memory_space<vmem>>, vector<1x8x1xf32>
    %19 = vector.shape_cast %18 : vector<1x8x1xf32> to vector<8x1xf32>
    %20 = vector.extract_strided_slice %4 {offsets = [2, 0], sizes = [1, 1024], strides = [1, 1]} : vector<3x1024xf32> to vector<1x1024xf32>
    %21 = vector.broadcast %19 : vector<8x1xf32> to vector<8x1024xf32>
    %22 = vector.broadcast %20 : vector<1x1024xf32> to vector<8x1024xf32>
    %23 = arith.mulf %21, %22 : vector<8x1024xf32>
    %24 = arith.addf %17, %23 : vector<8x1024xf32>
    %c0_8 = arith.constant 0 : index
    %c0_9 = arith.constant 0 : index
    %25 = vector.load %arg4[%c0_8, %c0_9] : memref<8x1xf32, #tpu.memory_space<vmem>>, vector<8x1xf32>
    %26 = vector.broadcast %25 : vector<8x1xf32> to vector<8x1024xf32>
    %27 = arith.addf %24, %26 : vector<8x1024xf32>
    %cst = arith.constant 0.707106769 : f32
    %28 = vector.broadcast %cst : f32 to vector<8x1024xf32>
    %29 = arith.mulf %27, %28 : vector<8x1024xf32>
    %30 = math.erf %29 : vector<8x1024xf32>
    %cst_10 = arith.constant 1.000000e+00 : f32
    %31 = vector.broadcast %cst_10 : f32 to vector<8x1024xf32>
    %32 = arith.addf %30, %31 : vector<8x1024xf32>
    %cst_11 = arith.constant 5.000000e-01 : f32
    %33 = vector.broadcast %cst_11 : f32 to vector<8x1024xf32>
    %34 = arith.mulf %27, %33 : vector<8x1024xf32>
    %35 = arith.addf %34, %32 : vector<8x1024xf32>
    %36 = arith.mulf %35, %32 : vector<8x1024xf32>
    %c0_12 = arith.constant 0 : index
    %c0_13 = arith.constant 0 : index
    %37 = arith.index_cast %1 : i32 to index
    %38 = vector.load %arg5[%c0_12, %c0_13, %37] : memref<1x8x2048xf32, #tpu.memory_space<vmem>>, vector<1x8x1024xf32>
    %39 = vector.shape_cast %38 : vector<1x8x1024xf32> to vector<8x1024xf32>
    %40 = vector.shape_cast %36 : vector<8x1024xf32> to vector<1x8x1024xf32>
    tpu.vector_store %arg5[%c0_12, %c0_13, %37], %40 {strides = array<i32>} : memref<1x8x2048xf32, #tpu.memory_space<vmem>>, vector<1x8x1024xf32>,
    %c1_i32 = arith.constant 1 : i32
    %c1024_i32_14 = arith.constant 1024 : i32
    %41 = arith.muli %c1_i32, %c1024_i32_14 : i32
    %42 = tpu.assume_multiple %41, 128 : i32
    %c0_15 = arith.constant 0 : index
    %c0_16 = arith.constant 0 : index
    %43 = arith.index_cast %42 : i32 to index
    %44 = vector.load %arg2[%c0_15, %c0_16, %43] : memref<1x3x2048xf32, #tpu.memory_space<vmem>>, vector<1x3x1024xf32>
    %45 = vector.shape_cast %44 : vector<1x3x1024xf32> to vector<3x1024xf32>
    %c0_17 = arith.constant 0 : index
    %c0_18 = arith.constant 0 : index
    %c0_19 = arith.constant 0 : index
    %46 = vector.load %arg3[%c0_17, %c0_18, %c0_19] : memref<3x8x1xf32, #tpu.memory_space<vmem>>, vector<1x8x1xf32>
    %47 = vector.shape_cast %46 : vector<1x8x1xf32> to vector<8x1xf32>
    %48 = vector.extract_strided_slice %45 {offsets = [0, 0], sizes = [1, 1024], strides = [1, 1]} : vector<3x1024xf32> to vector<1x1024xf32>
    %49 = vector.broadcast %47 : vector<8x1xf32> to vector<8x1024xf32>
    %50 = vector.broadcast %48 : vector<1x1024xf32> to vector<8x1024xf32>
    %51 = arith.mulf %49, %50 : vector<8x1024xf32>
    %c1_20 = arith.constant 1 : index
    %c0_21 = arith.constant 0 : index
    %c0_22 = arith.constant 0 : index
    %52 = vector.load %arg3[%c1_20, %c0_21, %c0_22] : memref<3x8x1xf32, #tpu.memory_space<vmem>>, vector<1x8x1xf32>
    %53 = vector.shape_cast %52 : vector<1x8x1xf32> to vector<8x1xf32>
    %54 = vector.extract_strided_slice %45 {offsets = [1, 0], sizes = [1, 1024], strides = [1, 1]} : vector<3x1024xf32> to vector<1x1024xf32>
    %55 = vector.broadcast %53 : vector<8x1xf32> to vector<8x1024xf32>
    %56 = vector.broadcast %54 : vector<1x1024xf32> to vector<8x1024xf32>
    %57 = arith.mulf %55, %56 : vector<8x1024xf32>
    %58 = arith.addf %51, %57 : vector<8x1024xf32>
    %c2_23 = arith.constant 2 : index
    %c0_24 = arith.constant 0 : index
    %c0_25 = arith.constant 0 : index
    %59 = vector.load %arg3[%c2_23, %c0_24, %c0_25] : memref<3x8x1xf32, #tpu.memory_space<vmem>>, vector<1x8x1xf32>
    %60 = vector.shape_cast %59 : vector<1x8x1xf32> to vector<8x1xf32>
    %61 = vector.extract_strided_slice %45 {offsets = [2, 0], sizes = [1, 1024], strides = [1, 1]} : vector<3x1024xf32> to vector<1x1024xf32>
    %62 = vector.broadcast %60 : vector<8x1xf32> to vector<8x1024xf32>
    %63 = vector.broadcast %61 : vector<1x1024xf32> to vector<8x1024xf32>
    %64 = arith.mulf %62, %63 : vector<8x1024xf32>
    %65 = arith.addf %58, %64 : vector<8x1024xf32>
    %c0_26 = arith.constant 0 : index
    %c0_27 = arith.constant 0 : index
    %66 = vector.load %arg4[%c0_26, %c0_27] : memref<8x1xf32, #tpu.memory_space<vmem>>, vector<8x1xf32>
    %67 = vector.broadcast %66 : vector<8x1xf32> to vector<8x1024xf32>
    %68 = arith.addf %65, %67 : vector<8x1024xf32>
    %cst_28 = arith.constant 0.707106769 : f32
    %69 = vector.broadcast %cst_28 : f32 to vector<8x1024xf32>
    %70 = arith.mulf %68, %69 : vector<8x1024xf32>
    %71 = math.erf %70 : vector<8x1024xf32>
    %cst_29 = arith.constant 1.000000e+00 : f32
    %72 = vector.broadcast %cst_29 : f32 to vector<8x1024xf32>
    %73 = arith.addf %71, %72 : vector<8x1024xf32>
    %cst_30 = arith.constant 5.000000e-01 : f32
    %74 = vector.broadcast %cst_30 : f32 to vector<8x1024xf32>
    %75 = arith.mulf %68, %74 : vector<8x1024xf32>
    %76 = arith.addf %75, %73 : vector<8x1024xf32>
    %77 = arith.mulf %76, %73 : vector<8x1024xf32>
    %c0_31 = arith.constant 0 : index
    %c0_32 = arith.constant 0 : index
    %78 = arith.index_cast %42 : i32 to index
    %79 = vector.load %arg5[%c0_31, %c0_32, %78] : memref<1x8x2048xf32, #tpu.memory_space<vmem>>, vector<1x8x1024xf32>
    %80 = vector.shape_cast %79 : vector<1x8x1024xf32> to vector<8x1024xf32>
    %81 = vector.shape_cast %77 : vector<8x1024xf32> to vector<1x8x1024xf32>
    tpu.vector_store %arg5[%c0_31, %c0_32, %78], %81 {strides = array<i32>} : memref<1x8x2048xf32, #tpu.memory_space<vmem>>, vector<1x8x1024xf32>,
    %c2_i32 = arith.constant 2 : i32
    return
  }
  func.func @transform_0(%arg0: i32, %arg1: i32) -> (i32, i32, i32) {
    %c0_i32 = arith.constant 0 : i32
    %c0_i32_0 = arith.constant 0 : i32
    return %arg0, %c0_i32, %arg1 : i32, i32, i32
  }
  func.func @transform_1(%arg0: i32, %arg1: i32) -> (i32, i32, i32) {
    %c0_i32 = arith.constant 0 : i32
    %c0_i32_0 = arith.constant 0 : i32
    %c0_i32_1 = arith.constant 0 : i32
    %c0_i32_2 = arith.constant 0 : i32
    return %c0_i32, %c0_i32_0, %c0_i32_1 : i32, i32, i32
  }
  func.func @transform_2(%arg0: i32, %arg1: i32) -> (i32, i32) {
    %c0_i32 = arith.constant 0 : i32
    %c0_i32_0 = arith.constant 0 : i32
    %c0_i32_1 = arith.constant 0 : i32
    return %c0_i32, %c0_i32_0 : i32, i32
  }
  func.func @transform_3(%arg0: i32, %arg1: i32) -> (i32, i32, i32) {
    %c0_i32 = arith.constant 0 : i32
    %c0_i32_0 = arith.constant 0 : i32
    return %arg0, %c0_i32, %arg1 : i32, i32, i32
  }
}

</mosaic_0001>

<bundles_post_ra>
// kernel: model_forward.1
= control target key start
LH: loop header
LB: loop body
LE: loop exit
PB: predicated region body
PF: predicated region fallthrough
CT: control target
= control target key end

     0   :  { %s1136_s12 = smov 0   ;;  %s1138_s13 = smov 0   ;;  %s1524_s0 = inlined_call_operand.vmem [shape: f32[1,3,4096], index: 0, kind: input, shape index: {}]   ;;  %s1525_s1 = inlined_call_operand.vmem [shape: f32[3,8,1], index: 1, kind: input, shape index: {}]   ;;  %s1526_s2 = inlined_call_operand.vmem [shape: f32[8,1], index: 2, kind: input, shape index: {}]   ;;  %s1527_s3 = inlined_call_operand.vmem [shape: f32[1,8,4096], index: 3, kind: output, shape index: {}]  }
   0x1   :  { %s1140_s14 = smov 0  }
   0x2 LB: > { %s22_s15 = sadd.s32 1, %s1109_s13  ;;  %p1009_p0 = scmp.ge.s32.totalorder %s1113_s14, 1  ;;  %s1113_s14 = sphi %s1140_s14, %s13_s14   ;;  %s1109_s13 = sphi %s1138_s13, %s1541_s13   ;;  %s1105_s12 = sphi %s1136_s12, %s1540_s12  }
   0x3   : > { %p23_p1 = scmp.ge.s32.totalorder %s22_s15, 2  ;;  %p158_p2 = scmp.lt.s32.totalorder %s1113_s14, 3 }
   0x5   : > { %s1543_s15 = smov (%p23_p1, %s22_s15), 0  ;;  %p159_p3 = pnand %p1009_p0, %p158_p2 }
   0x7   : > { %162 = sbr.rel (%p159_p3) target bundleno = 203 (0xcb), region = 32 }
   0xe   : > { %v569_v0 = vld [vmem:[%s1525_s1] sm:$0xff]  ;;  %v1115_v1 = vmov 0   ;;  %v1020_v2 = vld [vmem:[%s1525_s1 + $0x8] sm:$0xff]  ;;  %v1021_v3 = vld [vmem:[%s1525_s1 + $0x10] sm:$0xff]  ;;  %s1010_s24 = sshll.u32 %s1105_s12, 4  ;;  %v224_v5 = vlaneseq }
   0xf   : > { %1058 = vset.pattern.permute.xlu1 %v1115_v1  ;;  %1057 = vset.pattern.permute.xlu0 %v1115_v1  ;;  %v847_v4 = vld [vmem:[%s1526_s2] sm:$0xff]  ;;  %p193_p4 = scmp.lt.s32.totalorder %s1010_s24, 31 }
  0x10   : > { %572 = vperm.xlu1 %1058, %v569_v0   ;;  %217 = vperm.xlu0 %1057, %v569_v0   ;;  %v225_v6 = vshrl.u32 %v224_v5, 7 }
  0x11   : > { %s1545_s24 = smov (!%p193_p4, %s1010_s24), 31 }
  0x12   : > { %s1011_s25 = sshll.u32 %s1545_s24, 2  ;;  %v226_v7 = vsub.s32 0, %v225_v6  ;;  %v230_v9 = vsub.s32 4, %v225_v6  ;;  %v1181_v14 = vsub.s32 1, %v225_v6  ;;  %v1185_v16 = vsub.s32 2, %v225_v6  ;;  %s1013_s29 = sshll.u32 %s1545_s24, 3 }
  0x13   : > { %s198_s28 = scalar_lea.vmem %s1524_s0, %s1011_s25  ;;  %v1193_v21 = vsub.s32 5, %v225_v6  ;;  %v1222_v42 = vsub.s32 6, %v225_v6  ;;  %s1480_s5 = scalar_lea.vmem %s1527_s3, %s1013_s29 }
  0x14   : > { %662 = vperm.xlu1 %1058, %v1020_v2   ;;  %308 = vperm.xlu0 %1057, %v1020_v2   ;;  %v1172_v8 = vld [vmem:[%s198_s28 + $0x20] sm:$0x77]  ;;  %v1174_v10 = vld [vmem:[%s198_s28 + $0x28] sm:$0x77]  ;;  %v1176_v11 = vld [vmem:[%s198_s28 + $0x30] sm:$0x77] }
  0x15   : > { %v1178_v12 = vld [vmem:[%s198_s28 + $0x38] sm:$0x77]  ;;  %v582_v13 = vrot.slane %v1172_v8, %v226_v7  ;;  %v1183_v15 = vld [vmem:[%s198_s28] sm:$0x77]  ;;  %v586_v17 = vrot.slane %v1172_v8, %v230_v9  ;;  %v590_v18 = vrot.slane %v1174_v10, %v226_v7  ;;  %v1189_v19 = vld [vmem:[%s198_s28 + $0x8] sm:$0x77]  ;;  %v594_v22 = vrot.slane %v1174_v10, %v230_v9 }
  0x16   : > { %v1191_v20 = vld [vmem:[%s198_s28 + $0x10] sm:$0x77]  ;;  %v598_v23 = vrot.slane %v1176_v11, %v226_v7  ;;  %v602_v24 = vrot.slane %v1176_v11, %v230_v9  ;;  %v606_v25 = vrot.slane %v1178_v12, %v226_v7  ;;  %v1199_v26 = vld [vmem:[%s198_s28 + $0x18] sm:$0x77]  ;;  %v610_v27 = vrot.slane %v1178_v12, %v230_v9 }
  0x17   : > { %v1202_v28 = vrot.slane %v582_v13, %v226_v7  ;;  %v227_v29 = vrot.slane %v1183_v15, %v226_v7  ;;  %v231_v30 = vrot.slane %v1183_v15, %v230_v9  ;;  %v235_v31 = vrot.slane %v1189_v19, %v226_v7 }
  0x18   : > { %756 = vperm.xlu1 %1058, %v1021_v3   ;;  %403 = vperm.xlu0 %1057, %v1021_v3   ;;  %v239_v32 = vrot.slane %v1189_v19, %v230_v9  ;;  %v243_v33 = vrot.slane %v1191_v20, %v226_v7  ;;  %v247_v34 = vrot.slane %v1191_v20, %v230_v9 }
  0x19   : > { %v1210_v35 = vrot.slane %v586_v17, %v226_v7  ;;  %v1212_v36 = vrot.slane %v590_v18, %v226_v7  ;;  %v251_v37 = vrot.slane %v1199_v26, %v226_v7  ;;  %v255_v38 = vrot.slane %v1199_v26, %v230_v9 }
  0x1a   : > { %v1216_v39 = vrot.slane %v594_v22, %v226_v7  ;;  %v1218_v40 = vrot.slane %v598_v23, %v226_v7  ;;  %v1220_v41 = vrot.slane %v602_v24, %v226_v7  ;;  %v1224_v43 = vrot.slane %v606_v25, %v226_v7 }
  0x1b   : > { %v1226_v44 = vrot.slane %v610_v27, %v226_v7  ;;  %v1228_v45 = vrot.slane %v227_v29, %v226_v7  ;;  %v1230_v46 = vrot.slane %v231_v30, %v226_v7  ;;  %v1232_v47 = vrot.slane %v235_v31, %v226_v7 }
  0x1c   : > { %850 = vperm.xlu1 %1058, %v847_v4   ;;  %497 = vperm.xlu0 %1057, %v847_v4   ;;  %v1234_v48 = vrot.slane %v239_v32, %v226_v7  ;;  %v1236_v49 = vrot.slane %v243_v33, %v226_v7  ;;  %v1238_v50 = vrot.slane %v247_v34, %v226_v7 }
  0x1d   : > { %v1240_v51 = vrot.slane %v251_v37, %v226_v7  ;;  %v1242_v52 = vrot.slane %v255_v38, %v226_v7  ;;  %v668_v53 = vrot.slane %v1172_v8, %v1181_v14  ;;  %v672_v54 = vrot.slane %v1172_v8, %v1193_v21 }
  0x1e   : > { %v676_v55 = vrot.slane %v1174_v10, %v1181_v14  ;;  %v680_v56 = vrot.slane %v1174_v10, %v1193_v21  ;;  %v684_v57 = vrot.slane %v1176_v11, %v1181_v14  ;;  %v688_v58 = vrot.slane %v1176_v11, %v1193_v21 }
  0x1f   : > { %v692_v59 = vrot.slane %v1178_v12, %v1181_v14  ;;  %v696_v60 = vrot.slane %v1178_v12, %v1193_v21  ;;  %v314_v61 = vrot.slane %v1183_v15, %v1181_v14  ;;  %v318_v62 = vrot.slane %v1183_v15, %v1193_v21 }
  0x20   : > { %v322_v63 = vrot.slane %v1189_v19, %v1181_v14  ;;  %v326_v0 = vrot.slane %v1189_v19, %v1193_v21  ;;  %v330_v1 = vrot.slane %v1191_v20, %v1181_v14  ;;  %v334_v2 = vrot.slane %v1191_v20, %v1193_v21 }
  0x21   : > { %v1273_v3 = vrot.slane %v668_v53, %v1181_v14  ;;  %v1276_v4 = vrot.slane %v672_v54, %v1181_v14  ;;  %v338_v5 = vrot.slane %v1199_v26, %v1181_v14  ;;  %v342_v6 = vrot.slane %v1199_v26, %v1193_v21 }
  0x22   : > { %v1283_v7 = vrot.slane %v676_v55, %v1181_v14  ;;  %v1286_v9 = vrot.slane %v680_v56, %v1181_v14  ;;  %v1289_v13 = vrot.slane %v684_v57, %v1181_v14  ;;  %v1292_v17 = vrot.slane %v688_v58, %v1181_v14 }
  0x23   : > { %v1295_v18 = vrot.slane %v692_v59, %v1181_v14  ;;  %v1298_v22 = vrot.slane %v696_v60, %v1181_v14  ;;  %v1301_v21 = vrot.slane %v314_v61, %v1181_v14  ;;  %v1304_v23 = vrot.slane %v318_v62, %v1181_v14 }
  0x24   : > { %v1307_v24 = vrot.slane %v322_v63, %v1181_v14  ;;  %v1310_v25 = vrot.slane %v326_v0, %v1181_v14  ;;  %v1313_v27 = vrot.slane %v330_v1, %v1181_v14  ;;  %v1316_v29 = vrot.slane %v334_v2, %v1181_v14 }
  0x25   : > { %v1319_v30 = vrot.slane %v338_v5, %v1181_v14  ;;  %v1322_v31 = vrot.slane %v342_v6, %v1181_v14  ;;  %v762_v32 = vrot.slane %v1172_v8, %v1185_v16  ;;  %v766_v33 = vrot.slane %v1172_v8, %v1222_v42 }
  0x26   : > { %v770_v34 = vrot.slane %v1174_v10, %v1185_v16  ;;  %v774_v37 = vrot.slane %v1174_v10, %v1222_v42  ;;  %v778_v38 = vrot.slane %v1176_v11, %v1185_v16  ;;  %v782_v53 = vrot.slane %v1176_v11, %v1222_v42 }
  0x27   : > { %v786_v14 = vrot.slane %v1178_v12, %v1185_v16  ;;  %v790_v54 = vrot.slane %v1178_v12, %v1222_v42  ;;  %v409_v8 = vrot.slane %v1183_v15, %v1185_v16  ;;  %v413_v55 = vrot.slane %v1183_v15, %v1222_v42 }
  0x28   : > { %v417_v10 = vrot.slane %v1189_v19, %v1185_v16  ;;  %v421_v56 = vrot.slane %v1189_v19, %v1222_v42  ;;  %v425_v11 = vrot.slane %v1191_v20, %v1185_v16  ;;  %v429_v57 = vrot.slane %v1191_v20, %v1222_v42 }
  0x29   : > { %v802_v12 = vrot.slane %v762_v32, %v1185_v16  ;;  %v806_v58 = vrot.slane %v766_v33, %v1185_v16  ;;  %v433_v59 = vrot.slane %v1199_v26, %v1185_v16  ;;  %v437_v15 = vrot.slane %v1199_v26, %v1222_v42 }
  0x2a   : > { %v810_v60 = vrot.slane %v770_v34, %v1185_v16  ;;  %v814_v19 = vrot.slane %v774_v37, %v1185_v16  ;;  %v818_v61 = vrot.slane %v778_v38, %v1185_v16  ;;  %v822_v62 = vrot.slane %v782_v53, %v1185_v16 }
  0x2b   : > { %v826_v20 = vrot.slane %v786_v14, %v1185_v16  ;;  %v830_v63 = vrot.slane %v790_v54, %v1185_v16  ;;  %v1365_v0 = vrot.slane %v409_v8, %v1185_v16  ;;  %v1368_v1 = vrot.slane %v413_v55, %v1185_v16 }
  0x2c   : > { %v1371_v42 = vrot.slane %v417_v10, %v1185_v16  ;;  %v1374_v5 = vrot.slane %v421_v56, %v1185_v16  ;;  %v1377_v6 = vrot.slane %v425_v11, %v1185_v16  ;;  %v1380_v32 = vrot.slane %v429_v57, %v1185_v16 }
  0x2d   : > { %v1385_v37 = vrot.slane %v433_v59, %v1185_v16  ;;  %v1388_v38 = vrot.slane %v437_v15, %v1185_v16 }
  0x2e   : > { %1528 = vst [vmem:[#allocation2_spill] sm:$0xff] %v1371_v42  ;;  %1529 = vst [vmem:[#allocation3_spill] sm:$0xff] %v1374_v5 }
  0x2f   : > { %1530 = vst [vmem:[#allocation4_spill] sm:$0xff] %v1377_v6  ;;  %1531 = vst [vmem:[#allocation5_spill] sm:$0xff] %v1380_v32 }
  0x30   : > { %1532 = vst [vmem:[#allocation6_spill] sm:$0xff] %v1385_v37  ;;  %1533 = vst [vmem:[#allocation7_spill] sm:$0xff] %v1388_v38 }
  0x8f   : > { %v573_v2 = vpop.permute.xlu1 %572  ;;  %v218_v26 = vpop.permute.xlu0 %217 }
  0x90   : > { %v651_v33 = vmul.f32 %v1202_v28, %v573_v2  ;;  %v652_v34 = vmul.f32 %v1210_v35, %v573_v2  ;;  %v653_v53 = vmul.f32 %v1212_v36, %v573_v2  ;;  %v654_v14 = vmul.f32 %v1216_v39, %v573_v2 }
  0x91   : > { %v655_v54 = vmul.f32 %v1218_v40, %v573_v2  ;;  %v656_v8 = vmul.f32 %v1220_v41, %v573_v2  ;;  %v657_v55 = vmul.f32 %v1224_v43, %v573_v2  ;;  %v658_v28 = vmul.f32 %v1226_v44, %v573_v2 }
  0x92   : > { %v1397_v35 = vmul.f32 %v1228_v45, %v218_v26  ;;  %v1400_v10 = vmul.f32 %v1230_v46, %v218_v26  ;;  %v1403_v16 = vmul.f32 %v1232_v47, %v218_v26  ;;  %v1406_v36 = vmul.f32 %v1234_v48, %v218_v26 }
  0x93   : > { %v1409_v39 = vmul.f32 %v1236_v49, %v218_v26  ;;  %v1412_v40 = vmul.f32 %v1238_v50, %v218_v26  ;;  %v663_v41 = vpop.permute.xlu1 %662  ;;  %v309_v43 = vpop.permute.xlu0 %308  ;;  %v1423_v50 = vmul.f32 %v1240_v51, %v218_v26  ;;  %v1426_v57 = vmul.f32 %v1242_v52, %v218_v26 }
  0x94   : > { %v737_v44 = vmul.f32 %v1273_v3, %v663_v41  ;;  %v738_v45 = vmul.f32 %v1276_v4, %v663_v41  ;;  %v739_v46 = vmul.f32 %v1283_v7, %v663_v41  ;;  %v740_v47 = vmul.f32 %v1286_v9, %v663_v41 }
  0x95   : > { %v741_v56 = vmul.f32 %v1289_v13, %v663_v41  ;;  %v742_v48 = vmul.f32 %v1292_v17, %v663_v41  ;;  %v743_v49 = vmul.f32 %v1295_v18, %v663_v41  ;;  %v744_v11 = vmul.f32 %v1298_v22, %v663_v41 }
  0x96   : > { %v383_v3 = vmul.f32 %v1301_v21, %v309_v43  ;;  %v384_v4 = vmul.f32 %v1304_v23, %v309_v43  ;;  %v385_v7 = vmul.f32 %v1307_v24, %v309_v43  ;;  %v386_v9 = vmul.f32 %v1310_v25, %v309_v43 }
  0x97   : > { %v387_v13 = vmul.f32 %v1313_v27, %v309_v43  ;;  %v388_v17 = vmul.f32 %v1316_v29, %v309_v43  ;;  %v757_v18 = vpop.permute.xlu1 %756  ;;  %v745_v22 = vadd.f32 %v737_v44, %v651_v33  ;;  %v746_v59 = vadd.f32 %v738_v45, %v652_v34 }
  0x98   : > { %v747_v51 = vadd.f32 %v739_v46, %v653_v53  ;;  %v748_v15 = vadd.f32 %v740_v47, %v654_v14  ;;  %v749_v2 = vadd.f32 %v741_v56, %v655_v54  ;;  %v750_v52 = vadd.f32 %v742_v48, %v656_v8  ;;  %v404_v46 = vpop.permute.xlu0 %403 }
  0x99   : > { %v751_v26 = vadd.f32 %v743_v49, %v657_v55  ;;  %v752_v41 = vadd.f32 %v744_v11, %v658_v28  ;;  %v831_v21 = vmul.f32 %v802_v12, %v757_v18  ;;  %v832_v38 = vmul.f32 %v806_v58, %v757_v18 }
  0x9a   : > { %v833_v23 = vmul.f32 %v810_v60, %v757_v18  ;;  %v834_v37 = vmul.f32 %v814_v19, %v757_v18  ;;  %v835_v32 = vmul.f32 %v818_v61, %v757_v18  ;;  %v836_v25 = vmul.f32 %v822_v62, %v757_v18 }
  0x9b   : > { %v851_v24 = vpop.permute.xlu1 %850  ;;  %v837_v6 = vmul.f32 %v826_v20, %v757_v18  ;;  %v838_v27 = vmul.f32 %v830_v63, %v757_v18  ;;  %v839_v5 = vadd.f32 %v831_v21, %v745_v22  ;;  %v840_v29 = vadd.f32 %v832_v38, %v746_v59 }
  0x9c   : > { %v841_v42 = vadd.f32 %v833_v23, %v747_v51  ;;  %v842_v33 = vadd.f32 %v834_v37, %v748_v15  ;;  %v843_v34 = vadd.f32 %v835_v32, %v749_v2  ;;  %v844_v53 = vadd.f32 %v836_v25, %v750_v52  ;;  %v1534_v51 = vld [vmem:[#allocation2_spill] sm:$0xff]  ;;  %v1539_v2 = vld [vmem:[#allocation7_spill] sm:$0xff] }
  0x9d   : > { %v845_v14 = vadd.f32 %v837_v6, %v751_v26  ;;  %v846_v54 = vadd.f32 %v838_v27, %v752_v41  ;;  %v853_v8 = vadd.f32 %v851_v24, %v839_v5  ;;  %v854_v55 = vadd.f32 %v851_v24, %v840_v29 }
  0x9e   : > { %v855_v28 = vadd.f32 %v851_v24, %v841_v42  ;;  %v856_v12 = vadd.f32 %v851_v24, %v842_v33  ;;  %v857_v58 = vadd.f32 %v851_v24, %v843_v34  ;;  %v858_v60 = vadd.f32 %v851_v24, %v844_v53 }
  0x9f   : > { %v859_v19 = vadd.f32 %v851_v24, %v845_v14  ;;  %v860_v44 = vadd.f32 %v851_v24, %v846_v54  ;;  %v389_v61 = vmul.f32 %v1319_v30, %v309_v43  ;;  %v861_v62 = vmul.f32 0.70710677, %v853_v8 }
  0xa0   : > { %v862_v20 = vmul.f32 0.70710677, %v854_v55  ;;  %v863_v63 = vmul.f32 0.70710677, %v855_v28  ;;  %v390_v38 = vmul.f32 %v1322_v31, %v309_v43  ;;  %v864_v37 = vmul.f32 0.70710677, %v856_v12 }
  0xa1   : > { %v865_v32 = vmul.f32 0.70710677, %v857_v58  ;;  %v391_v6 = vadd.f32 %v383_v3, %v1397_v35  ;;  %v866_v45 = vmul.f32 0.70710677, %v858_v60  ;;  %v867_v5 = vmul.f32 0.70710677, %v859_v19 }
  0xa2   : > { %1059 = verf.f32 %v861_v62  ;;  %v392_v42 = vadd.f32 %v384_v4, %v1400_v10  ;;  %v868_v47 = vmul.f32 0.70710677, %v860_v44  ;;  %v885_v56 = vmul.f32 0.5, %v853_v8 }
  0xa3   : > { %1061 = verf.f32 %v862_v20  ;;  %v886_v48 = vmul.f32 0.5, %v854_v55  ;;  %v887_v30 = vmul.f32 0.5, %v855_v28  ;;  %v1438_v49 = vmul.f32 0.5, %v856_v12 }
  0xa4   : > { %1063 = verf.f32 %v863_v63  ;;  %v1440_v11 = vmul.f32 0.5, %v857_v58  ;;  %v1442_v31 = vmul.f32 0.5, %v858_v60  ;;  %v393_v35 = vadd.f32 %v385_v7, %v1403_v16  ;;  %v1535_v16 = vld [vmem:[#allocation3_spill] sm:$0xff] }
  0xa5   : > { %1065 = verf.f32 %v864_v37  ;;  %v394_v43 = vadd.f32 %v386_v9, %v1406_v36  ;;  %v395_v10 = vadd.f32 %v387_v13, %v1409_v39  ;;  %v396_v3 = vadd.f32 %v388_v17, %v1412_v40  ;;  %v1536_v36 = vld [vmem:[#allocation4_spill] sm:$0xff]  ;;  %v498_v39 = vpop.permute.xlu0 %497  ;;  %v1537_v13 = vld [vmem:[#allocation5_spill] sm:$0xff]  ;;  %v1538_v17 = vld [vmem:[#allocation6_spill] sm:$0xff] }
  0xa6   : > { %1067 = verf.f32 %v865_v32  ;;  %v397_v4 = vadd.f32 %v389_v61, %v1423_v50  ;;  %v398_v18 = vadd.f32 %v390_v38, %v1426_v57  ;;  %v478_v22 = vmul.f32 %v1365_v0, %v404_v46 }
  0xa7   : > { %1069 = verf.f32 %v866_v45  ;;  %v479_v59 = vmul.f32 %v1368_v1, %v404_v46  ;;  %v480_v15 = vmul.f32 %v1534_v51, %v404_v46  ;;  %v481_v7 = vmul.f32 %v1535_v16, %v404_v46 }
  0xa8   : > { %1071 = verf.f32 %v867_v5  ;;  %v482_v9 = vmul.f32 %v1536_v36, %v404_v46  ;;  %v483_v40 = vmul.f32 %v1537_v13, %v404_v46  ;;  %v484_v50 = vmul.f32 %v1538_v17, %v404_v46 }
  0xa9   : > { %1073 = verf.f32 %v868_v47  ;;  %v485_v57 = vmul.f32 %v1539_v2, %v404_v46  ;;  %v486_v52 = vadd.f32 %v478_v22, %v391_v6  ;;  %v487_v0 = vadd.f32 %v479_v59, %v392_v42 }
  0xaa   : > { %v488_v26 = vadd.f32 %v480_v15, %v393_v35  ;;  %v489_v1 = vadd.f32 %v481_v7, %v394_v43  ;;  %v490_v41 = vadd.f32 %v482_v9, %v395_v10  ;;  %v491_v21 = vadd.f32 %v483_v40, %v396_v3 }
  0xab   : > { %v492_v23 = vadd.f32 %v484_v50, %v397_v4  ;;  %v493_v24 = vadd.f32 %v485_v57, %v398_v18  ;;  %v1458_v27 = vadd.f32 %v498_v39, %v486_v52  ;;  %v1460_v29 = vadd.f32 %v498_v39, %v487_v0 }
  0xac   : > { %v1060_v25 = vpop.eup %1059  ;;  %v1462_v33 = vadd.f32 %v498_v39, %v488_v26  ;;  %v1464_v34 = vadd.f32 %v498_v39, %v489_v1  ;;  %v891_v54 = vmul.f32 0.5, %v859_v19  ;;  %v892_v8 = vmul.f32 0.5, %v860_v44 }
  0xad   : > { %v1062_v53 = vpop.eup %1061  ;;  %v877_v14 = vadd.f32 1.0, %v1060_v25  ;;  %v1467_v55 = vadd.f32 %v498_v39, %v490_v41  ;;  %v1469_v58 = vadd.f32 %v498_v39, %v491_v21  ;;  %v1471_v60 = vadd.f32 %v498_v39, %v492_v23 }
  0xae   : > { %v1064_v28 = vpop.eup %1063  ;;  %v878_v12 = vadd.f32 1.0, %v1062_v53  ;;  %v1473_v61 = vadd.f32 %v498_v39, %v493_v24  ;;  %v508_v38 = vmul.f32 0.70710677, %v1458_v27  ;;  %v509_v37 = vmul.f32 0.70710677, %v1460_v29 }
  0xaf   : > { %v1066_v62 = vpop.eup %1065  ;;  %v879_v20 = vadd.f32 1.0, %v1064_v28  ;;  %v893_v63 = vadd.f32 %v885_v56, %v877_v14  ;;  %v510_v6 = vmul.f32 0.70710677, %v1462_v33  ;;  %v511_v45 = vmul.f32 0.70710677, %v1464_v34 }
  0xb0   : > { %v1068_v32 = vpop.eup %1067  ;;  %v880_v19 = vadd.f32 1.0, %v1066_v62  ;;  %v894_v44 = vadd.f32 %v886_v48, %v878_v12  ;;  %v512_v56 = vmul.f32 0.70710677, %v1467_v55  ;;  %v513_v48 = vmul.f32 0.70710677, %v1469_v58 }
  0xb1   : > { %v1070_v5 = vpop.eup %1069  ;;  %v881_v42 = vadd.f32 1.0, %v1068_v32  ;;  %v895_v46 = vadd.f32 %v887_v30, %v879_v20  ;;  %v901_v47 = vmul.f32 %v893_v63, %v877_v14  ;;  %1075 = verf.f32 %v508_v38 }
  0xb2   : > { %v1072_v35 = vpop.eup %1071  ;;  %v882_v43 = vadd.f32 1.0, %v1070_v5  ;;  %v896_v10 = vadd.f32 %v1438_v49, %v880_v19  ;;  %v902_v3 = vmul.f32 %v894_v44, %v878_v12  ;;  %1077 = verf.f32 %v509_v37 }
  0xb3   : > { %v1074_v4 = vpop.eup %1073  ;;  %v883_v18 = vadd.f32 1.0, %v1072_v35  ;;  %v897_v22 = vadd.f32 %v1440_v11, %v881_v42  ;;  %v903_v59 = vmul.f32 %v895_v46, %v879_v20  ;;  %1022 = vst [vmem:[%s1480_s5 + $0x40] sm:$0xff] %v901_v47  ;;  %v514_v7 = vmul.f32 0.70710677, %v1471_v60 }
  0xb4   : > { %v884_v30 = vadd.f32 1.0, %v1074_v4  ;;  %v898_v51 = vadd.f32 %v1442_v31, %v882_v43  ;;  %v904_v15 = vmul.f32 %v896_v10, %v880_v19  ;;  %1023 = vst [vmem:[%s1480_s5 + $0x48] sm:$0xff] %v902_v3  ;;  %1079 = verf.f32 %v510_v6 }
  0xb5   : > { %v899_v49 = vadd.f32 %v891_v54, %v883_v18  ;;  %v905_v16 = vmul.f32 %v897_v22, %v881_v42  ;;  %1024 = vst [vmem:[%s1480_s5 + $0x50] sm:$0xff] %v903_v59  ;;  %v515_v9 = vmul.f32 0.70710677, %v1473_v61  ;;  %1081 = verf.f32 %v511_v45 }
  0xb6   : > { %v900_v11 = vadd.f32 %v892_v8, %v884_v30  ;;  %v906_v36 = vmul.f32 %v898_v51, %v882_v43  ;;  %1025 = vst [vmem:[%s1480_s5 + $0x58] sm:$0xff] %v904_v15  ;;  %1083 = verf.f32 %v512_v56  ;;  %v532_v50 = vmul.f32 0.5, %v1458_v27 }
  0xb7   : > { %v907_v39 = vmul.f32 %v899_v49, %v883_v18  ;;  %1026 = vst [vmem:[%s1480_s5 + $0x60] sm:$0xff] %v905_v16  ;;  %1085 = verf.f32 %v513_v48  ;;  %v533_v52 = vmul.f32 0.5, %v1460_v29  ;;  %v534_v1 = vmul.f32 0.5, %v1462_v33 }
  0xb8   : > { %v908_v31 = vmul.f32 %v900_v11, %v884_v30  ;;  %1027 = vst [vmem:[%s1480_s5 + $0x68] sm:$0xff] %v906_v36  ;;  %1087 = verf.f32 %v514_v7  ;;  %v535_v24 = vmul.f32 0.5, %v1464_v34  ;;  %v536_v54 = vmul.f32 0.5, %v1467_v55 }
  0xb9   : > { %1028 = vst [vmem:[%s1480_s5 + $0x70] sm:$0xff] %v907_v39  ;;  %1089 = verf.f32 %v515_v9  ;;  %v537_v12 = vmul.f32 0.5, %v1469_v58  ;;  %v538_v34 = vmul.f32 0.5, %v1471_v60  ;;  %v539_v32 = vmul.f32 0.5, %v1473_v61 }
  0xba   : > { %1029 = vst [vmem:[%s1480_s5 + $0x78] sm:$0xff] %v908_v31 }
  0xbb   : > { %v1076_v13 = vpop.eup %1075 }
  0xbc   : > { %v1078_v40 = vpop.eup %1077  ;;  %v524_v17 = vadd.f32 1.0, %v1076_v13 }
  0xbd   : > { %v525_v57 = vadd.f32 1.0, %v1078_v40 }
  0xbe   : > { %v1080_v2 = vpop.eup %1079  ;;  %v540_v41 = vadd.f32 %v532_v50, %v524_v17 }
  0xbf   : > { %v1082_v0 = vpop.eup %1081  ;;  %v526_v26 = vadd.f32 1.0, %v1080_v2  ;;  %v541_v25 = vadd.f32 %v533_v52, %v525_v57 }
  0xc0   : > { %v1084_v21 = vpop.eup %1083  ;;  %v527_v23 = vadd.f32 1.0, %v1082_v0  ;;  %v548_v8 = vmul.f32 %v540_v41, %v524_v17 }
  0xc1   : > { %v1086_v53 = vpop.eup %1085  ;;  %v528_v14 = vadd.f32 1.0, %v1084_v21  ;;  %v542_v27 = vadd.f32 %v534_v1, %v526_v26  ;;  %v549_v62 = vmul.f32 %v541_v25, %v525_v57 }
  0xc2   : > { %v1088_v28 = vpop.eup %1087  ;;  %v529_v29 = vadd.f32 1.0, %v1086_v53  ;;  %v543_v33 = vadd.f32 %v535_v24, %v527_v23  ;;  %556 = vst [vmem:[%s1480_s5] sm:$0xff] %v548_v8 }
  0xc3   : > { %v1090_v20 = vpop.eup %1089  ;;  %v530_v63 = vadd.f32 1.0, %v1088_v28  ;;  %v544_v38 = vadd.f32 %v536_v54, %v528_v14  ;;  %v550_v37 = vmul.f32 %v542_v27, %v526_v26  ;;  %557 = vst [vmem:[%s1480_s5 + $0x8] sm:$0xff] %v549_v62 }
  0xc4   : > { %v531_v55 = vadd.f32 1.0, %v1090_v20  ;;  %v545_v19 = vadd.f32 %v537_v12, %v529_v29  ;;  %v551_v58 = vmul.f32 %v543_v33, %v527_v23 }
  0xc5   : > { %v546_v44 = vadd.f32 %v538_v34, %v530_v63  ;;  %v552_v6 = vmul.f32 %v544_v38, %v528_v14  ;;  %558 = vst [vmem:[%s1480_s5 + $0x10] sm:$0xff] %v550_v37 }
  0xc6   : > { %v547_v45 = vadd.f32 %v539_v32, %v531_v55  ;;  %v553_v5 = vmul.f32 %v545_v19, %v529_v29  ;;  %559 = vst [vmem:[%s1480_s5 + $0x18] sm:$0xff] %v551_v58 }
  0xc7   : > { %v554_v60 = vmul.f32 %v546_v44, %v530_v63  ;;  %560 = vst [vmem:[%s1480_s5 + $0x20] sm:$0xff] %v552_v6 }
  0xc8   : > { %v555_v42 = vmul.f32 %v547_v45, %v531_v55  ;;  %561 = vst [vmem:[%s1480_s5 + $0x28] sm:$0xff] %v553_v5 }
  0xc9   : > { %562 = vst [vmem:[%s1480_s5 + $0x30] sm:$0xff] %v554_v60 }
  0xca   : > { %563 = vst [vmem:[%s1480_s5 + $0x38] sm:$0xff] %v555_v42 }
  0xcb PF: > { %s13_s14 = sadd.s32 1, %s1113_s14   ;;  %s1540_s12 = smov %s1109_s13 }
  0xcc   : > { %p10_p5 = scmp.ge.s32.totalorder %s13_s14, 4   ;;  %s1541_s13 = smov %s1543_s15 }
  0xce   :  { %12 = sbr.rel (!%p10_p5) target bundleno = 2 (0x2), region = 66 }

</bundles_post_ra>
